<compile_context>
chip_gen: v5e
topology: v5e:2x2
jax: 0.10.0
libtpu: 0.0.40
codegen_flags: <defaults>
</compile_context>

<pallas_src>
import functools

import jax
import jax.numpy as jnp
from jax.experimental import pallas as pl
from jax.experimental.pallas import tpu as pltpu


# ----------------------------------------------------------------------------
# Kernels
# ----------------------------------------------------------------------------

def _tap_conv_bias_relu(x_ref, w_ref, b_ref, c_out, l_out, kernel_size, dilation):
    """relu(bias + sum_k W_k @ x_pad[:, k*d : k*d + L_out]) in f32.

    x_ref: (1, C_in, L_out + padding)  left-padded input block
    w_ref: (K, C_out, C_in)            per-tap weight matrices
    b_ref: (C_out, 1)                  bias
    """
    acc = jnp.zeros((c_out, l_out), jnp.float32)
    for k in range(kernel_size):                      # K is small & static -> unrolled
        off = k * dilation                            # static slice per tap
        x_k = x_ref[0, :, off:off + l_out]            # (C_in, L_out)
        acc = acc + jnp.dot(w_ref[k], x_k, preferred_element_type=jnp.float32)
    acc = acc + b_ref[...]                            # (C_out, 1) broadcast over lanes
    return jnp.maximum(acc, 0.0)


def _conv_relu_kernel(x_ref, w_ref, b_ref, o_ref, *, kernel_size, dilation):
    """First half of the block: relu1(chomp1(conv1(x)))."""
    h = _tap_conv_bias_relu(x_ref, w_ref, b_ref,
                            o_ref.shape[1], o_ref.shape[-1], kernel_size, dilation)
    o_ref[0] = h.astype(o_ref.dtype)


def _conv_res_relu_ds_kernel(h_ref, w_ref, b_ref, x_ref, wd_ref, bd_ref, o_ref,
                             *, kernel_size, dilation):
    """Second half with 1x1 downsample residual fused in the epilogue."""
    h2 = _tap_conv_bias_relu(h_ref, w_ref, b_ref,
                             o_ref.shape[1], o_ref.shape[-1], kernel_size, dilation)
    res = jnp.dot(wd_ref[...], x_ref[0], preferred_element_type=jnp.float32) + bd_ref[...]
    o_ref[0] = jnp.maximum(h2 + res, 0.0).astype(o_ref.dtype)


def _conv_res_relu_id_kernel(h_ref, w_ref, b_ref, x_ref, o_ref,
                             *, kernel_size, dilation):
    """Second half with identity residual fused in the epilogue."""
    h2 = _tap_conv_bias_relu(h_ref, w_ref, b_ref,
                             o_ref.shape[1], o_ref.shape[-1], kernel_size, dilation)
    res = x_ref[0].astype(jnp.float32)
    o_ref[0] = jnp.maximum(h2 + res, 0.0).astype(o_ref.dtype)


# ----------------------------------------------------------------------------
# Wrappers
# ----------------------------------------------------------------------------

def _weight_norm(v, g):
    """PyTorch weight_norm (dim=0): w = g * v / ||v||, norm over (C_in, K)."""
    norm = jnp.sqrt(jnp.sum(v.astype(jnp.float32) ** 2, axis=(1, 2), keepdims=True))
    return (g * v / norm).astype(v.dtype)


def _causal_conv_relu(x, w, b, *, dilation, padding):
    """relu(chomp(conv1d(x, w, b))) — chomp folded away (left pad only)."""
    n, c_in, l = x.shape
    c_out, _, k = w.shape
    assert padding == dilation * (k - 1), "causal config required for residual add"

    x_pad = jnp.pad(x, ((0, 0), (0, 0), (padding, 0)))      # left pad only
    w_taps = jnp.transpose(w, (2, 0, 1))                     # (K, C_out, C_in)
    b2d = b.reshape(c_out, 1)

    kern = functools.partial(_conv_relu_kernel, kernel_size=k, dilation=dilation)
    return pl.pallas_call(
        kern,
        out_shape=jax.ShapeDtypeStruct((n, c_out, l), x.dtype),
        grid=(n,),
        in_specs=[
            pl.BlockSpec((1, c_in, l + padding), lambda i: (i, 0, 0)),
            pl.BlockSpec((k, c_out, c_in), lambda i: (0, 0, 0)),
            pl.BlockSpec((c_out, 1), lambda i: (0, 0)),
        ],
        out_specs=pl.BlockSpec((1, c_out, l), lambda i: (i, 0, 0)),
        compiler_params=pltpu.CompilerParams(dimension_semantics=("parallel",)),
    )(x_pad, w_taps, b2d)


def temporal_block_forward(x, params, *, kernel_size, stride, dilation, padding):
    """Inference forward of TemporalBlock: relu(net(x) + residual(x))."""
    assert stride == 1, "TemporalBlock residual add requires stride == 1"
    n, c_in, l = x.shape
    w1 = _weight_norm(params["v1"], params["g1"])            # (C_out, C_in, K)
    w2 = _weight_norm(params["v2"], params["g2"])            # (C_out, C_out, K)
    c_out = w1.shape[0]
    has_ds = "w_down" in params

    # --- conv1 + chomp1 + relu1 (+ dropout1 == identity) ---
    h1 = _causal_conv_relu(x, w1, params["b1"], dilation=dilation, padding=padding)

    # --- conv2 + chomp2 + relu2 (+ dropout2 == identity) + residual + relu ---
    h1_pad = jnp.pad(h1, ((0, 0), (0, 0), (padding, 0)))
    w2_taps = jnp.transpose(w2, (2, 0, 1))
    b2_2d = params["b2"].reshape(c_out, 1)

    if has_ds:
        wd2d = params["w_down"].reshape(c_out, c_in)         # 1x1 conv == matmul
        bd2d = params["b_down"].reshape(c_out, 1)
        kern = functools.partial(_conv_res_relu_ds_kernel,
                                 kernel_size=kernel_size, dilation=dilation)
        return pl.pallas_call(
            kern,
            out_shape=jax.ShapeDtypeStruct((n, c_out, l), x.dtype),
            grid=(n,),
            in_specs=[
                pl.BlockSpec((1, c_out, l + padding), lambda i: (i, 0, 0)),
                pl.BlockSpec((kernel_size, c_out, c_out), lambda i: (0, 0, 0)),
                pl.BlockSpec((c_out, 1), lambda i: (0, 0)),
                pl.BlockSpec((1, c_in, l), lambda i: (i, 0, 0)),
                pl.BlockSpec((c_out, c_in), lambda i: (0, 0)),
                pl.BlockSpec((c_out, 1), lambda i: (0, 0)),
            ],
            out_specs=pl.BlockSpec((1, c_out, l), lambda i: (i, 0, 0)),
            compiler_params=pltpu.CompilerParams(dimension_semantics=("parallel",)),
        )(h1_pad, w2_taps, b2_2d, x, wd2d, bd2d)
    else:
        kern = functools.partial(_conv_res_relu_id_kernel,
                                 kernel_size=kernel_size, dilation=dilation)
        return pl.pallas_call(
            kern,
            out_shape=jax.ShapeDtypeStruct((n, c_out, l), x.dtype),
            grid=(n,),
            in_specs=[
                pl.BlockSpec((1, c_out, l + padding), lambda i: (i, 0, 0)),
                pl.BlockSpec((kernel_size, c_out, c_out), lambda i: (0, 0, 0)),
                pl.BlockSpec((c_out, 1), lambda i: (0, 0)),
                pl.BlockSpec((1, c_out, l), lambda i: (i, 0, 0)),
            ],
            out_specs=pl.BlockSpec((1, c_out, l), lambda i: (i, 0, 0)),
            compiler_params=pltpu.CompilerParams(dimension_semantics=("parallel",)),
        )(h1_pad, w2_taps, b2_2d, x)


# ----------------------------------------------------------------------------
# Pure-JAX reference (mirrors PyTorch forward) and demo
# ----------------------------------------------------------------------------

def _ref_causal_conv(x, w, b, dilation, padding):
    y = jax.lax.conv_general_dilated(
        x, w, window_strides=(1,), padding=[(padding, padding)],
        rhs_dilation=(dilation,), dimension_numbers=("NCH", "OIH", "NCH"))
    y = y + b[None, :, None]
    return y[:, :, :x.shape[2]]                              # chomp(padding)


def _ref_temporal_block(x, params, kernel_size, dilation, padding):
    w1 = _weight_norm(params["v1"], params["g1"])
    w2 = _weight_norm(params["v2"], params["g2"])
    h1 = jax.nn.relu(_ref_causal_conv(x, w1, params["b1"], dilation, padding))
    h2 = jax.nn.relu(_ref_causal_conv(h1, w2, params["b2"], dilation, padding))
    if "w_down" in params:
        res = jax.lax.conv_general_dilated(
            x, params["w_down"], (1,), [(0, 0)],
            dimension_numbers=("NCH", "OIH", "NCH")) + params["b_down"][None, :, None]
    else:
        res = x
    return jax.nn.relu(h2 + res)


def _make_params(key, c_in, c_out, k, with_downsample):
    keys = jax.random.split(key, 8)
    params = {
        "v1": 0.01 * jax.random.normal(keys[0], (c_out, c_in, k), jnp.float32),
        "g1": 1.0 + 0.1 * jax.random.normal(keys[1], (c_out, 1, 1), jnp.float32),
        "b1": 0.1 * jax.random.normal(keys[2], (c_out,), jnp.float32),
        "v2": 0.01 * jax.random.normal(keys[3], (c_out, c_out, k), jnp.float32),
        "g2": 1.0 + 0.1 * jax.random.normal(keys[4], (c_out, 1, 1), jnp.float32),
        "b2": 0.1 * jax.random.normal(keys[5], (c_out,), jnp.float32),
    }
    if with_downsample:
        params["w_down"] = 0.01 * jax.random.normal(keys[6], (c_out, c_in, 1), jnp.float32)
        params["b_down"] = 0.1 * jax.random.normal(keys[7], (c_out,), jnp.float32)
    return params


if __name__ == "__main__":
    key = jax.random.PRNGKey(0)
    k_x1, k_p1, k_x2, k_p2 = jax.random.split(key, 4)

    # Config 1: n_inputs != n_outputs -> downsample (1x1 conv) residual path.
    N, C_IN, C_OUT, L = 2, 4, 8, 16
    K, STRIDE, DILATION = 3, 1, 2
    PADDING = (K - 1) * DILATION
    x1 = jax.random.normal(k_x1, (N, C_IN, L), jnp.float32)
    p1 = _make_params(k_p1, C_IN, C_OUT, K, with_downsample=True)

    out1 = temporal_block_forward(x1, p1, kernel_size=K, stride=STRIDE,
                                  dilation=DILATION, padding=PADDING)
    out1 = jax.block_until_ready(out1)
    ref1 = _ref_temporal_block(x1, p1, K, DILATION, PADDING)
    assert out1.shape == (N, C_OUT, L) and out1.dtype == x1.dtype
    assert jnp.allclose(out1, ref1, atol=1e-5, rtol=1e-5), "downsample path mismatch"

    # Config 2: n_inputs == n_outputs -> identity residual path.
    C2, D2 = 8, 1
    P2 = (K - 1) * D2
    x2 = jax.random.normal(k_x2, (N, C2, L), jnp.float32)
    p2 = _make_params(k_p2, C2, C2, K, with_downsample=False)

    out2 = temporal_block_forward(x2, p2, kernel_size=K, stride=STRIDE,
                                  dilation=D2, padding=P2)
    out2 = jax.block_until_ready(out2)
    ref2 = _ref_temporal_block(x2, p2, K, D2, P2)
    assert out2.shape == (N, C2, L) and out2.dtype == x2.dtype
    assert jnp.allclose(out2, ref2, atol=1e-5, rtol=1e-5), "identity path mismatch"

    print("KERNEL_OK")
</pallas_src>

<mosaic_0001>
module attributes {stable_mosaic.version = 11 : i64} {
  func.func @_conv_relu_kernel(%arg0: i32, %arg1: memref<1x4x20xf32, #tpu.memory_space<vmem>>, %arg2: memref<3x8x4xf32, #tpu.memory_space<vmem>>, %arg3: memref<8x1xf32, #tpu.memory_space<vmem>>, %arg4: memref<1x8x16xf32, #tpu.memory_space<vmem>>) attributes {dimension_semantics = [#tpu.dimension_semantics<parallel>], iteration_bounds = array<i64: 2>, scalar_prefetch = 0 : i64, scratch_operands = 0 : i64, tpu.core_type = #tpu.core_type<tc>, window_params = [{transform_indices = @transform_0, window_bounds = array<i64: 1, 4, 20>}, {pipeline_mode = #tpu.pipeline_mode<synchronous>, transform_indices = @transform_1, window_bounds = array<i64: 3, 8, 4>}, {pipeline_mode = #tpu.pipeline_mode<synchronous>, transform_indices = @transform_2, window_bounds = array<i64: 8, 1>}, {transform_indices = @transform_3, window_bounds = array<i64: 1, 8, 16>}]} {
    %cst = arith.constant 0.000000e+00 : f32
    %0 = vector.broadcast %cst : f32 to vector<8x16xf32>
    %c0 = arith.constant 0 : index
    %c0_0 = arith.constant 0 : index
    %c0_1 = arith.constant 0 : index
    %1 = vector.load %arg1[%c0, %c0_0, %c0_1] : memref<1x4x20xf32, #tpu.memory_space<vmem>>, vector<1x4x16xf32>
    %2 = vector.shape_cast %1 : vector<1x4x16xf32> to vector<4x16xf32>
    %c0_2 = arith.constant 0 : index
    %c0_3 = arith.constant 0 : index
    %c0_4 = arith.constant 0 : index
    %3 = vector.load %arg2[%c0_2, %c0_3, %c0_4] : memref<3x8x4xf32, #tpu.memory_space<vmem>>, vector<1x8x4xf32>
    %4 = vector.shape_cast %3 : vector<1x8x4xf32> to vector<8x4xf32>
    %cst_5 = arith.constant dense<0.000000e+00> : vector<8x16xf32>
    %5 = tpu.matmul %4, %2, %cst_5 {dimension_numbers = #tpu.dot_dimension_numbers<[1], [0], [0], [1], [0, 0, 1, 1], [], []>} : vector<8x4xf32>, vector<4x16xf32>, vector<8x16xf32> -> vector<8x16xf32>
    %6 = arith.addf %0, %5 : vector<8x16xf32>
    %c0_6 = arith.constant 0 : index
    %c0_7 = arith.constant 0 : index
    %c2 = arith.constant 2 : index
    %7 = vector.load %arg1[%c0_6, %c0_7, %c2] : memref<1x4x20xf32, #tpu.memory_space<vmem>>, vector<1x4x16xf32>
    %8 = vector.shape_cast %7 : vector<1x4x16xf32> to vector<4x16xf32>
    %c1 = arith.constant 1 : index
    %c0_8 = arith.constant 0 : index
    %c0_9 = arith.constant 0 : index
    %9 = vector.load %arg2[%c1, %c0_8, %c0_9] : memref<3x8x4xf32, #tpu.memory_space<vmem>>, vector<1x8x4xf32>
    %10 = vector.shape_cast %9 : vector<1x8x4xf32> to vector<8x4xf32>
    %cst_10 = arith.constant dense<0.000000e+00> : vector<8x16xf32>
    %11 = tpu.matmul %10, %8, %cst_10 {dimension_numbers = #tpu.dot_dimension_numbers<[1], [0], [0], [1], [0, 0, 1, 1], [], []>} : vector<8x4xf32>, vector<4x16xf32>, vector<8x16xf32> -> vector<8x16xf32>
    %12 = arith.addf %6, %11 : vector<8x16xf32>
    %c0_11 = arith.constant 0 : index
    %c0_12 = arith.constant 0 : index
    %c4 = arith.constant 4 : index
    %13 = vector.load %arg1[%c0_11, %c0_12, %c4] : memref<1x4x20xf32, #tpu.memory_space<vmem>>, vector<1x4x16xf32>
    %14 = vector.shape_cast %13 : vector<1x4x16xf32> to vector<4x16xf32>
    %c2_13 = arith.constant 2 : index
    %c0_14 = arith.constant 0 : index
    %c0_15 = arith.constant 0 : index
    %15 = vector.load %arg2[%c2_13, %c0_14, %c0_15] : memref<3x8x4xf32, #tpu.memory_space<vmem>>, vector<1x8x4xf32>
    %16 = vector.shape_cast %15 : vector<1x8x4xf32> to vector<8x4xf32>
    %cst_16 = arith.constant dense<0.000000e+00> : vector<8x16xf32>
    %17 = tpu.matmul %16, %14, %cst_16 {dimension_numbers = #tpu.dot_dimension_numbers<[1], [0], [0], [1], [0, 0, 1, 1], [], []>} : vector<8x4xf32>, vector<4x16xf32>, vector<8x16xf32> -> vector<8x16xf32>
    %18 = arith.addf %12, %17 : vector<8x16xf32>
    %c0_17 = arith.constant 0 : index
    %c0_18 = arith.constant 0 : index
    %19 = vector.load %arg3[%c0_17, %c0_18] : memref<8x1xf32, #tpu.memory_space<vmem>>, vector<8x1xf32>
    %20 = vector.broadcast %19 : vector<8x1xf32> to vector<8x16xf32>
    %21 = arith.addf %18, %20 : vector<8x16xf32>
    %cst_19 = arith.constant 0.000000e+00 : f32
    %22 = vector.broadcast %cst_19 : f32 to vector<8x16xf32>
    %23 = arith.maximumf %21, %22 : vector<8x16xf32>
    %c0_20 = arith.constant 0 : index
    %c0_21 = arith.constant 0 : index
    %c0_22 = arith.constant 0 : index
    %24 = vector.load %arg4[%c0_20, %c0_21, %c0_22] : memref<1x8x16xf32, #tpu.memory_space<vmem>>, vector<1x8x16xf32>
    %25 = vector.shape_cast %24 : vector<1x8x16xf32> to vector<8x16xf32>
    %26 = vector.shape_cast %23 : vector<8x16xf32> to vector<1x8x16xf32>
    tpu.vector_store %arg4[%c0_20, %c0_21, %c0_22], %26 {strides = array<i32>} : memref<1x8x16xf32, #tpu.memory_space<vmem>>, vector<1x8x16xf32>,
    return
  }
  func.func @transform_0(%arg0: i32) -> (i32, i32, i32) {
    %c0_i32 = arith.constant 0 : i32
    %c0_i32_0 = arith.constant 0 : i32
    %c0_i32_1 = arith.constant 0 : i32
    return %arg0, %c0_i32, %c0_i32_0 : i32, i32, i32
  }
  func.func @transform_1(%arg0: i32) -> (i32, i32, i32) {
    %c0_i32 = arith.constant 0 : i32
    %c0_i32_0 = arith.constant 0 : i32
    %c0_i32_1 = arith.constant 0 : i32
    %c0_i32_2 = arith.constant 0 : i32
    return %c0_i32, %c0_i32_0, %c0_i32_1 : i32, i32, i32
  }
  func.func @transform_2(%arg0: i32) -> (i32, i32) {
    %c0_i32 = arith.constant 0 : i32
    %c0_i32_0 = arith.constant 0 : i32
    %c0_i32_1 = arith.constant 0 : i32
    return %c0_i32, %c0_i32_0 : i32, i32
  }
  func.func @transform_3(%arg0: i32) -> (i32, i32, i32) {
    %c0_i32 = arith.constant 0 : i32
    %c0_i32_0 = arith.constant 0 : i32
    %c0_i32_1 = arith.constant 0 : i32
    return %arg0, %c0_i32, %c0_i32_0 : i32, i32, i32
  }
}

</mosaic_0001>

<bundles_post_ra>
// kernel: tpu_custom_call.1
= control target key start
LH: loop header
LB: loop body
LE: loop exit
PB: predicated region body
PF: predicated region fallthrough
CT: control target
= control target key end

     0   :  { %8 = vsyncpa [#allocation3], 0  ;;  %s589_s0 = inlined_call_operand.vmem [shape: f32[2,4,20], index: 0, kind: input, shape index: {}]   ;;  %s590_s1 = inlined_call_operand.vmem [shape: f32[3,8,4], index: 1, kind: input, shape index: {}]   ;;  %s591_s2 = inlined_call_operand.vmem [shape: f32[8,1], index: 2, kind: input, shape index: {}]   ;;  %s592_s3 = inlined_call_operand.hbm [shape: f32[2,8,16], index: 3, kind: output, shape index: {}]  }
   0x1   :  { %10 = vsyncpa [#allocation3 + $0x1], 0  ;;  %s489_s12 = smov 0   ;;  %s491_s13 = smov 0  }
   0x2   :  { %s493_s14 = smov 0   ;;  %s495_s15 = smov 0  }
   0x3 LB: > { %s510_s16 = sadd.s32 4294967295, %s464_s15   ;;  %s340_s17 = sadd.s32 4294967294, %s464_s15   ;;  %s464_s15 = sphi %s495_s15, %s598_s15   ;;  %s460_s14 = sphi %s493_s14, %s597_s14   ;;  %s456_s13 = sphi %s491_s13, %s596_s13   ;;  %s452_s12 = sphi %s489_s12, %s595_s12  }
   0x4   : > { %s514_s18 = sadd.s32 1, %s464_s15   ;;  %s91_s19 = sadd.s32 1, %s460_s14 }
   0x5   : > { %s88_s20 = ssub.s32 %s464_s15, %s514_s18  ;;  %p101_p0 = scmp.ne.s32.totalorder %s460_s14, %s456_s13 }
   0x6   : > { %p89_p1 = scmp.eq.s32.totalorder %s88_s20, 0  ;;  %p102_p2 = scmp.eq.s32.totalorder %s510_s16, 1 }
   0x7   : > { %p107_p3 = scmp.ne.s32.totalorder %s456_s13, %s452_s12  ;;  %p108_p4 = scmp.eq.s32.totalorder %s340_s17, 1 }
   0x8   : > { %s525_s21 = scalar_select %p89_p1, %s460_s14, %s91_s19  }
   0x9   : > { %p527_p5 = por %p102_p2, %p101_p0  ;;  %p531_p6 = por %p108_p4, %p107_p3 }
   0xa   : > { %p343_p7 = scmp.ge.s32.totalorder %s464_s15, 1  ;;  %p139_p8 = scmp.lt.s32.totalorder %s464_s15, 3 }
   0xc   : > { %p140_p9 = pnand %p343_p7, %p139_p8 }
   0xd   : > { %p162_p10 = scmp.lt.s32.totalorder (!%p140_p9), %s510_s16, 1  ;;  %s466_s29 = smov (!%p140_p9), 124  }
   0xe   : > { %143 = sbr.rel (%p140_p9) target bundleno = 285 (0x11d), region = 32  ;;  %s467_s30 = smov (!%p140_p9), 126  }
   0xf   : > { %s159_s17 = sand.u32 (!%p140_p9), 1, %s456_s13   ;;  %s355_s20 = sshll.u32 (!%p140_p9), %s510_s16, 3 }
  0x10   : > { %s344_s19 = sshll.u32 (!%p140_p9), %s159_s17, 3  ;;  %s276_s26 = scalar_lea.hbm (!%p140_p9), %s592_s3, %s355_s20 }
  0x11   : > { %s161_s27 = scalar_lea.vmem (!%p140_p9), [#allocation2], %s344_s19  ;;  %s422_s7 = scalar_lea.hbm (!%p140_p9), %s592_s3, 16 }
  0x13   : > { %s163_s24 = scalar_select %p162_p10, %s510_s16, 1  ;;  %vm177_vm0 = vcmask 1043456   ;;  %vm173_vm1 = vcmask 31744   ;;  %v167_v1 = vld [vmem:[%s590_s1] sm:$0xff]  ;;  %v468_v3 = vmov 0   ;;  %v351_v4 = vld [vmem:[%s590_s1 + $0x10] sm:$0xff] }
  0x14   : > { %v255_v2 = vld [vmem:[%s591_s2] sm:$0xff]  ;;  %400 = vset.pattern.permute.xlu1 %v468_v3  ;;  %401 = vset.pattern.permute.xlu0 %v468_v3  ;;  %v346_v6 = vld [vmem:[%s590_s1 + $0x8] sm:$0xff]  ;;  %vm263_vm2 = vcmask 130048   ;;  %s266_s16 = scalar_lea.sflag [#allocation3], %s159_s17 }
  0x15   : > { %s345_s25 = sshll.u32 %s163_s24, 2  ;;  %258 = vperm.xlu1 %400, %v255_v2  }
  0x16   : > { %s165_s28 = scalar_lea.vmem %s589_s0, %s345_s25 }
  0x17   : > { %v166_v0 = vld [vmem:[%s165_s28] sm:$0xf]  ;;  %s278_s28 = sshll.u32 %s161_s27, 4  ;;  %s279_s28 = int_to_ptr.vmem [resolvable:$true] %s278_s28 }
  0x18   : > { %227 = vrot.lane.b32.xlu0 %v166_v0, %s466_s29  ;;  %349 = vmatpush.msk.msra.mxu1 %vm177_vm0, %v166_v0  ;;  %s280_s29 = sshll.u32 %s276_s26, 4  ;;  %s281_s29 = int_to_ptr.hbm [resolvable:$true] %s280_s29 }
  0x19   : > { %350 = vmatmul.msk.f32.vlgmr.msra.gmra.mxu1 %vm173_vm1, %v167_v1 }
  0x20   : > { %171 = vrot.lane.b32.xlu0 %v166_v0, %s467_s30  ;;  %s416_s30 = sshra.s32 %s281_s29, 4  ;;  %s417_s30 = int_to_ptr.hbm [resolvable:$true] %s416_s30 }
  0x21   : > { %s418_s4 = scalar_lea.hbm %s417_s30, 8  ;;  %p423_p0 = scmp.lt.s32.totalorder %s417_s30, %s592_s3 }
  0x22   : > { %p419_p11 = scmp.ne.s32.totalorder %s417_s30, %s418_s4  ;;  %p424_p1 = scmp.lt.s32.totalorder %s422_s7, %s418_s4 }
  0x24   : > { %p420_p12 = pnand %p419_p11, %p527_p5  ;;  %p425_p2 = por %p424_p1, %p423_p0 }
  0x26   : > { %p421_p13 = pneg %p420_p12 }
  0x28   : > { %p426_p3 = pnand %p425_p2, %p421_p13 }
  0x87   : > { %v259_v12 = vpop.permute.xlu1 %258 }
  0x8a   : > { %v228_v5 = vpop.permute.xlu0 %227 }
  0x8b   : > { %352 = vmatpush.msk.msra.mxu2 %vm177_vm0, %v228_v5 }
  0x8c   : > { %353 = vmatmul.msk.f32.vlgmr.msra.gmra.mxu2 %vm173_vm1, %v351_v4 }
  0x92   : > { %v172_v7 = vpop.permute.xlu0 %171 }
  0x93   : > { %347 = vmatpush.msk.msra.mxu0 %vm177_vm0, %v172_v7 }
  0x94   : > { %348 = vmatmul.msk.f32.vlgmr.msra.gmra.mxu0 %vm173_vm1, %v346_v6 }
  0x96   : > { %v222_v8 = vpop.f32.mrf.mxu1 }
 0x10f   : > { %v251_v10 = vpop.f32.mrf.mxu2 }
 0x111   : > { %v197_v9 = vpop.f32.mrf.mxu0 }
 0x112   : > { %v223_v11 = vadd.f32 %v222_v8, %v197_v9 }
 0x114   : > { %v254_v13 = vadd.f32 %v251_v10, %v223_v11 }
 0x116   : > { %v261_v14 = vadd.f32 %v259_v12, %v254_v13 }
 0x118   : > { %v262_v15 = vmax.f32 %v261_v14, 0.0 }
 0x11a   : > { %264 = vst.msk [vmem:[%s161_s27] sm:$0xff] %vm263_vm2, %v262_v15 }
 0x11b   : > { %429 = shalt.err (!%p426_p3)
}
 0x11c   : > { %358 = dma.vmem_to_hbm [thread:$0]  (%p527_p5), %s279_s28, 128, %s281_s29, %s266_s16  }
 0x11d PF: > { %p364_p4 = scmp.ge.s32.totalorder %s464_s15, 2  ;;  %s292_s10 = sand.u32 1, %s452_s12  }
 0x11e   : > { %s293_s11 = scalar_lea.sflag [#allocation3], %s292_s10 }
 0x11f   : > { %p361_p7 = pnand %p364_p4, %p531_p6 }
 0x121   : > { %p362_p8 = pneg %p361_p7 }
 0x123   : > { %447 = dma.done.wait (%p362_p8), %s293_s11, 128  }
 0x124   : > { %449 = vsyncadd (%p362_p8), %s293_s11, 4294967168  ;;  %p13_p9 = scmp.ge.s32.totalorder %s514_s18, 4   ;;  %s595_s12 = smov %s456_s13 }
 0x125   : > { %s596_s13 = smov %s460_s14  ;;  %s597_s14 = smov %s525_s21 }
 0x126   : > { %s598_s15 = smov %s514_s18  ;;  %15 = sbr.rel (!%p13_p9) target bundleno = 3 (0x3), region = 69 }
 0x12b   :  { %299 = vsyncpa [#allocation3], 1 }
 0x12c   :  { %301 = vsyncpa [#allocation3 + $0x1], 1 }

</bundles_post_ra>
